<compile_context>
chip_gen: v7x
topology: tpu7x:2x2x1
jax: 0.10.0
libtpu: 0.0.40
codegen_flags: <defaults>
</compile_context>

<pallas_src>
import functools

import jax
import jax.numpy as jnp
from jax.experimental import pallas as pl
from jax.experimental.pallas import tpu as pltpu


def _round_up(x, m):
    return ((x + m - 1) // m) * m


_HALO_ROWS = 8  # sublane-aligned halo block (only row 0 is actually used)


def _proj_kernel_k1(z_ref, w_ref, b_ref, out_ref):
    """Fallback path (k == 1): one (batch, patch-tile) step, patch == single chunk.

    z_ref: (1, TP, K) im2col rows; w_ref: (1, K, E); b_ref: (1, E); out_ref: (1, TP, E).
    """
    acc = jnp.dot(z_ref[0], w_ref[0], preferred_element_type=jnp.float32)
    out_ref[0] = (acc + b_ref[...]).astype(out_ref.dtype)


def _proj_kernel_k2(z_ref, zh_ref, w_ref, b_ref, out_ref, *, tile_p):
    """Fast path (patch_size == 2*stride): out[p] = chunk[p]@W0 + chunk[p+1]@W1 + b.

    z_ref:  (1, TP, K) non-overlapping half-patch chunks for this tile
    zh_ref: (1, 8, K)  halo: first chunk rows of the next tile (row 0 used)
    w_ref:  (2, K, E)  half-patch weight pieces, resident in VMEM
    b_ref:  (1, E)     bias, resident in VMEM
    out_ref:(1, TP, E)
    """
    tp = tile_p
    bias = b_ref[...]
    # Rows 0 .. TP-2: both half-patches live inside this tile's chunk block.
    main = (
        jnp.dot(z_ref[0, : tp - 1, :], w_ref[0], preferred_element_type=jnp.float32)
        + jnp.dot(z_ref[0, 1:, :], w_ref[1], preferred_element_type=jnp.float32)
        + bias
    )
    out_ref[0, : tp - 1, :] = main.astype(out_ref.dtype)
    # Last row: its second half-patch is the first chunk of the next tile (halo row).
    last = (
        jnp.dot(z_ref[0, tp - 1 :, :], w_ref[0], preferred_element_type=jnp.float32)
        + jnp.dot(zh_ref[0, :1, :], w_ref[1], preferred_element_type=jnp.float32)
        + bias
    )
    out_ref[0, tp - 1 :, :] = last.astype(out_ref.dtype)


def _patch_embed_forward(x, weight, bias, *, patch_size, stride, num_patches,
                         tile_p=512):
    B, C, L = x.shape
    E = weight.shape[0]
    ps, st, P = patch_size, stride, num_patches

    if ps == 2 * st:
        # Fast path: chunks are the non-overlapping half-patches (no im2col duplication).
        k = 2
        Kc = C * st
        n_chunks = P + 1                                   # (P + 1) * st <= L holds here
        xt = jnp.transpose(x, (0, 2, 1))[:, : n_chunks * st, :]     # (B, T, C)
        z = xt.reshape(B, n_chunks, Kc)                    # chunk flatten order: (tap, chan)
        w_pieces = [
            jnp.transpose(weight[:, :, j * st:(j + 1) * st], (0, 2, 1)).reshape(E, Kc).T
            for j in range(k)
        ]
        w_stack = jnp.stack(w_pieces, axis=0)              # (2, Kc, E)
    else:
        # Fallback (e.g. odd patch_size): tiled im2col, single weight piece.
        k = 1
        Kc = C * ps
        idx = jnp.arange(P)[:, None] * st + jnp.arange(ps)[None, :]      # (P, ps)
        patches = jnp.transpose(x[:, :, idx], (0, 2, 1, 3))              # (B, P, C, ps)
        z = patches.reshape(B, P, Kc)                      # chunk flatten order: (chan, tap)
        w_stack = weight.reshape(E, Kc).T[None]            # (1, Kc, E)

    # Tile the patch dimension.  Input chunk rows are padded so every INPUT block
    # (including the last tile's halo block) is fully in bounds; the OUTPUT is left
    # unpadded -- Pallas masks write-back of the partial last block.
    tp = max(8, min(_round_up(tile_p, 8), _round_up(P, 8)))
    nt = pl.cdiv(P, tp)
    p_pad = nt * tp
    z_rows = p_pad + (_HALO_ROWS if k == 2 else 0)
    if z.shape[1] < z_rows:
        z = jnp.pad(z, ((0, 0), (0, z_rows - z.shape[1]), (0, 0)))
    bias_2d = bias.reshape(1, E)

    z_spec = pl.BlockSpec((1, tp, Kc), lambda b, i: (b, i, 0))
    halo_spec = pl.BlockSpec((1, _HALO_ROWS, Kc),
                             lambda b, i: (b, (i + 1) * (tp // _HALO_ROWS), 0))
    w_spec = pl.BlockSpec((k, Kc, E), lambda b, i: (0, 0, 0))    # VMEM-resident weights
    b_spec = pl.BlockSpec((1, E), lambda b, i: (0, 0))           # VMEM-resident bias

    if k == 2:
        kernel = functools.partial(_proj_kernel_k2, tile_p=tp)
        in_specs = [z_spec, halo_spec, w_spec, b_spec]
        operands = (z, z, w_stack, bias_2d)
    else:
        kernel = _proj_kernel_k1
        in_specs = [z_spec, w_spec, b_spec]
        operands = (z, w_stack, bias_2d)

    out = pl.pallas_call(
        kernel,
        out_shape=jax.ShapeDtypeStruct((B, P, E), x.dtype),
        grid_spec=pl.GridSpec(
            grid=(B, nt),
            in_specs=in_specs,
            out_specs=pl.BlockSpec((1, tp, E), lambda b, i: (b, i, 0)),
        ),
        compiler_params=pltpu.CompilerParams(
            dimension_semantics=("parallel", "parallel"),
        ),
    )(*operands)
    return out


class PatchEmbed:
    """JAX/Pallas equivalent of the PyTorch PatchEmbed module (forward only)."""

    def __init__(self, seq_len, patch_size=4, in_chans=30, embed_dim=128,
                 key=None, tile_p=512):
        self.seq_len = seq_len
        self.patch_size = patch_size
        self.stride = max(1, patch_size // 2)
        self.num_patches = int((seq_len - patch_size) / self.stride + 1)
        self.in_chans = in_chans
        self.embed_dim = embed_dim
        self.tile_p = tile_p

        if key is None:
            key = jax.random.PRNGKey(0)
        kw, kb = jax.random.split(key)
        fan_in = in_chans * patch_size
        bound = 1.0 / (fan_in ** 0.5)
        # weight layout matches nn.Conv1d: (embed_dim, in_chans, patch_size)
        self.weight = jax.random.uniform(
            kw, (embed_dim, in_chans, patch_size), jnp.float32, -bound, bound)
        self.bias = jax.random.uniform(kb, (embed_dim,), jnp.float32, -bound, bound)

    def __call__(self, x):
        B, C, L = x.shape
        assert C == self.in_chans and L == self.seq_len
        return _patch_embed_forward(
            x, self.weight, self.bias,
            patch_size=self.patch_size, stride=self.stride,
            num_patches=self.num_patches, tile_p=self.tile_p)


def _reference_forward(module, x):
    # Pure-JAX reference: conv1d via lax.conv_general_dilated, then transpose.
    y = jax.lax.conv_general_dilated(
        x, module.weight, window_strides=(module.stride,), padding="VALID",
        dimension_numbers=("NCH", "OIH", "NCH"),
        precision=jax.lax.Precision.HIGHEST,
    ) + module.bias[None, :, None]
    return jnp.transpose(y, (0, 2, 1))


def _bf16_representable(a):
    # Snap test data to bf16-representable f32 so kernel/reference agreement does not
    # depend on the MXU / XLA f32-matmul precision mode.
    return a.astype(jnp.bfloat16).astype(jnp.float32)


if __name__ == "__main__":
    key = jax.random.PRNGKey(0)

    # (batch, in_chans, seq_len, patch_size, embed_dim, tile_p)
    configs = [
        (2, 4, 16, 4, 32, 512),    # fast path (k=2), single patch tile, partial out block
        (2, 4, 18, 4, 32, 8),      # fast path, P == tile -> last valid row uses the halo
        (2, 4, 40, 4, 32, 8),      # fast path, several tiles -> interior halo rows
        (2, 4, 21, 5, 32, 512),    # odd patch size -> tiled im2col fallback (k=1)
        (2, 30, 64, 4, 128, 512),  # default-ish channels / embed_dim (lane-dense E=128)
    ]
    for cfg_i, (batch, in_chans, seq_len, patch_size, embed_dim, tile_p) in enumerate(configs):
        k_x, k_p = jax.random.split(jax.random.fold_in(key, cfg_i))
        module = PatchEmbed(seq_len=seq_len, patch_size=patch_size,
                            in_chans=in_chans, embed_dim=embed_dim,
                            key=k_p, tile_p=tile_p)
        module.weight = _bf16_representable(module.weight)
        module.bias = _bf16_representable(module.bias)
        x = _bf16_representable(
            jax.random.normal(k_x, (batch, in_chans, seq_len), jnp.float32))

        out = jax.block_until_ready(module(x))
        ref = jax.block_until_ready(_reference_forward(module, x))

        assert out.shape == (batch, module.num_patches, embed_dim), out.shape
        err = float(jnp.max(jnp.abs(out - ref)))
        assert jnp.allclose(out, ref, atol=1e-4, rtol=1e-4), (cfg_i, err)

    print("KERNEL_OK")
</pallas_src>

<mosaic_0001>
module attributes {stable_mosaic.version = 11 : i64} {
  func.func @_proj_kernel_k2(%arg0: i32, %arg1: i32, %arg2: memref<1x8x8xf32, #tpu.memory_space<vmem>>, %arg3: memref<1x8x8xf32, #tpu.memory_space<vmem>>, %arg4: memref<2x8x32xf32, #tpu.memory_space<vmem>>, %arg5: memref<1x32xf32, #tpu.memory_space<vmem>>, %arg6: memref<1x8x32xf32, #tpu.memory_space<vmem>>) attributes {dimension_semantics = [#tpu.dimension_semantics<parallel>, #tpu.dimension_semantics<parallel>], iteration_bounds = array<i64: 2, 1>, scalar_prefetch = 0 : i64, scratch_operands = 0 : i64, tpu.core_type = #tpu.core_type<tc>, window_params = [{transform_indices = @transform_0, window_bounds = array<i64: 1, 8, 8>}, {transform_indices = @transform_1, window_bounds = array<i64: 1, 8, 8>}, {pipeline_mode = #tpu.pipeline_mode<synchronous>, transform_indices = @transform_2, window_bounds = array<i64: 2, 8, 32>}, {pipeline_mode = #tpu.pipeline_mode<synchronous>, transform_indices = @transform_3, window_bounds = array<i64: 1, 32>}, {transform_indices = @transform_4, window_bounds = array<i64: 1, 8, 32>}]} {
    %c0 = arith.constant 0 : index
    %c0_0 = arith.constant 0 : index
    %0 = vector.load %arg5[%c0, %c0_0] : memref<1x32xf32, #tpu.memory_space<vmem>>, vector<1x32xf32>
    %c0_1 = arith.constant 0 : index
    %c0_2 = arith.constant 0 : index
    %c0_3 = arith.constant 0 : index
    %1 = vector.load %arg2[%c0_1, %c0_2, %c0_3] : memref<1x8x8xf32, #tpu.memory_space<vmem>>, vector<1x7x8xf32>
    %2 = vector.shape_cast %1 : vector<1x7x8xf32> to vector<7x8xf32>
    %c0_4 = arith.constant 0 : index
    %c0_5 = arith.constant 0 : index
    %c0_6 = arith.constant 0 : index
    %3 = vector.load %arg4[%c0_4, %c0_5, %c0_6] : memref<2x8x32xf32, #tpu.memory_space<vmem>>, vector<1x8x32xf32>
    %4 = vector.shape_cast %3 : vector<1x8x32xf32> to vector<8x32xf32>
    %cst = arith.constant dense<0.000000e+00> : vector<7x32xf32>
    %5 = tpu.matmul %2, %4, %cst {dimension_numbers = #tpu.dot_dimension_numbers<[1], [0], [0], [1], [0, 0, 1, 1], [], []>} : vector<7x8xf32>, vector<8x32xf32>, vector<7x32xf32> -> vector<7x32xf32>
    %c0_7 = arith.constant 0 : index
    %c1 = arith.constant 1 : index
    %c0_8 = arith.constant 0 : index
    %6 = vector.load %arg2[%c0_7, %c1, %c0_8] : memref<1x8x8xf32, #tpu.memory_space<vmem>>, vector<1x7x8xf32>
    %7 = vector.shape_cast %6 : vector<1x7x8xf32> to vector<7x8xf32>
    %c1_9 = arith.constant 1 : index
    %c0_10 = arith.constant 0 : index
    %c0_11 = arith.constant 0 : index
    %8 = vector.load %arg4[%c1_9, %c0_10, %c0_11] : memref<2x8x32xf32, #tpu.memory_space<vmem>>, vector<1x8x32xf32>
    %9 = vector.shape_cast %8 : vector<1x8x32xf32> to vector<8x32xf32>
    %cst_12 = arith.constant dense<0.000000e+00> : vector<7x32xf32>
    %10 = tpu.matmul %7, %9, %cst_12 {dimension_numbers = #tpu.dot_dimension_numbers<[1], [0], [0], [1], [0, 0, 1, 1], [], []>} : vector<7x8xf32>, vector<8x32xf32>, vector<7x32xf32> -> vector<7x32xf32>
    %11 = arith.addf %5, %10 : vector<7x32xf32>
    %12 = vector.broadcast %0 : vector<1x32xf32> to vector<7x32xf32>
    %13 = arith.addf %11, %12 : vector<7x32xf32>
    %c0_13 = arith.constant 0 : index
    %c0_14 = arith.constant 0 : index
    %c0_15 = arith.constant 0 : index
    %14 = vector.load %arg6[%c0_13, %c0_14, %c0_15] : memref<1x8x32xf32, #tpu.memory_space<vmem>>, vector<1x7x32xf32>
    %15 = vector.shape_cast %14 : vector<1x7x32xf32> to vector<7x32xf32>
    %16 = vector.shape_cast %13 : vector<7x32xf32> to vector<1x7x32xf32>
    tpu.vector_store %arg6[%c0_13, %c0_14, %c0_15], %16 {strides = array<i32>} : memref<1x8x32xf32, #tpu.memory_space<vmem>>, vector<1x7x32xf32>,
    %c0_16 = arith.constant 0 : index
    %c7 = arith.constant 7 : index
    %c0_17 = arith.constant 0 : index
    %17 = vector.load %arg2[%c0_16, %c7, %c0_17] : memref<1x8x8xf32, #tpu.memory_space<vmem>>, vector<1x1x8xf32>
    %18 = vector.shape_cast %17 : vector<1x1x8xf32> to vector<1x8xf32>
    %c0_18 = arith.constant 0 : index
    %c0_19 = arith.constant 0 : index
    %c0_20 = arith.constant 0 : index
    %19 = vector.load %arg4[%c0_18, %c0_19, %c0_20] : memref<2x8x32xf32, #tpu.memory_space<vmem>>, vector<1x8x32xf32>
    %20 = vector.shape_cast %19 : vector<1x8x32xf32> to vector<8x32xf32>
    %cst_21 = arith.constant dense<0.000000e+00> : vector<1x32xf32>
    %21 = tpu.matmul %18, %20, %cst_21 {dimension_numbers = #tpu.dot_dimension_numbers<[1], [0], [0], [1], [0, 0, 1, 1], [], []>} : vector<1x8xf32>, vector<8x32xf32>, vector<1x32xf32> -> vector<1x32xf32>
    %c0_22 = arith.constant 0 : index
    %c0_23 = arith.constant 0 : index
    %c0_24 = arith.constant 0 : index
    %22 = vector.load %arg3[%c0_22, %c0_23, %c0_24] : memref<1x8x8xf32, #tpu.memory_space<vmem>>, vector<1x1x8xf32>
    %23 = vector.shape_cast %22 : vector<1x1x8xf32> to vector<1x8xf32>
    %c1_25 = arith.constant 1 : index
    %c0_26 = arith.constant 0 : index
    %c0_27 = arith.constant 0 : index
    %24 = vector.load %arg4[%c1_25, %c0_26, %c0_27] : memref<2x8x32xf32, #tpu.memory_space<vmem>>, vector<1x8x32xf32>
    %25 = vector.shape_cast %24 : vector<1x8x32xf32> to vector<8x32xf32>
    %cst_28 = arith.constant dense<0.000000e+00> : vector<1x32xf32>
    %26 = tpu.matmul %23, %25, %cst_28 {dimension_numbers = #tpu.dot_dimension_numbers<[1], [0], [0], [1], [0, 0, 1, 1], [], []>} : vector<1x8xf32>, vector<8x32xf32>, vector<1x32xf32> -> vector<1x32xf32>
    %27 = arith.addf %21, %26 : vector<1x32xf32>
    %28 = arith.addf %27, %0 : vector<1x32xf32>
    %c0_29 = arith.constant 0 : index
    %c7_30 = arith.constant 7 : index
    %c0_31 = arith.constant 0 : index
    %29 = vector.load %arg6[%c0_29, %c7_30, %c0_31] : memref<1x8x32xf32, #tpu.memory_space<vmem>>, vector<1x1x32xf32>
    %30 = vector.shape_cast %29 : vector<1x1x32xf32> to vector<1x32xf32>
    %31 = vector.shape_cast %28 : vector<1x32xf32> to vector<1x1x32xf32>
    tpu.vector_store %arg6[%c0_29, %c7_30, %c0_31], %31 {strides = array<i32>} : memref<1x8x32xf32, #tpu.memory_space<vmem>>, vector<1x1x32xf32>,
    return
  }
  func.func @transform_0(%arg0: i32, %arg1: i32) -> (i32, i32, i32) {
    %c0_i32 = arith.constant 0 : i32
    %c0_i32_0 = arith.constant 0 : i32
    return %arg0, %arg1, %c0_i32 : i32, i32, i32
  }
  func.func @transform_1(%arg0: i32, %arg1: i32) -> (i32, i32, i32) {
    %c1_i32 = arith.constant 1 : i32
    %0 = arith.addi %arg1, %c1_i32 : i32
    %c1_i32_0 = arith.constant 1 : i32
    %1 = arith.muli %0, %c1_i32_0 : i32
    %c0_i32 = arith.constant 0 : i32
    %c0_i32_1 = arith.constant 0 : i32
    return %arg0, %1, %c0_i32 : i32, i32, i32
  }
  func.func @transform_2(%arg0: i32, %arg1: i32) -> (i32, i32, i32) {
    %c0_i32 = arith.constant 0 : i32
    %c0_i32_0 = arith.constant 0 : i32
    %c0_i32_1 = arith.constant 0 : i32
    %c0_i32_2 = arith.constant 0 : i32
    return %c0_i32, %c0_i32_0, %c0_i32_1 : i32, i32, i32
  }
  func.func @transform_3(%arg0: i32, %arg1: i32) -> (i32, i32) {
    %c0_i32 = arith.constant 0 : i32
    %c0_i32_0 = arith.constant 0 : i32
    %c0_i32_1 = arith.constant 0 : i32
    return %c0_i32, %c0_i32_0 : i32, i32
  }
  func.func @transform_4(%arg0: i32, %arg1: i32) -> (i32, i32, i32) {
    %c0_i32 = arith.constant 0 : i32
    %c0_i32_0 = arith.constant 0 : i32
    return %arg0, %arg1, %c0_i32 : i32, i32, i32
  }
}

</mosaic_0001>

<bundles_post_ra>
// kernel: tpu_custom_call.1
= control target key start
LH: loop header
LB: loop body
LE: loop exit
PB: predicated region body
PF: predicated region fallthrough
CT: control target
= control target key end

     0   :  { %s802_s15 = smov 0   ;;  %s804_s16 = smov 0   ;;  %s855_s0 = inlined_call_operand.vmem [shape: f32[2,16,8], index: 0, kind: input, shape index: {}]   ;;  %s856_s1 = inlined_call_operand.vmem [shape: f32[2,16,8], index: 1, kind: input, shape index: {}]   ;;  %s857_s2 = inlined_call_operand.vmem [shape: f32[2,8,32], index: 2, kind: input, shape index: {}]   ;;  %s858_s3 = inlined_call_operand.vmem [shape: f32[1,32], index: 3, kind: input, shape index: {}]   ;;  %s859_s4 = inlined_call_operand.vmem [shape: f32[2,7,32], index: 4, kind: output, shape index: {}]  }
   0x1   :  { %s806_s17 = smov 0  }
   0x2 LB: > { %s26_s18 = sadd.s32 1, %s769_s16  ;;  %p679_p0 = scmp.ge.s32.totalorder %s773_s17, 1  ;;  %s773_s17 = sphi %s806_s17, %s14_s17   ;;  %s769_s16 = sphi %s804_s16, %s861_s16   ;;  %s765_s15 = sphi %s802_s15, %s860_s15  }
   0x3   : > { %p28_p1 = scmp.ge.s32.totalorder %s26_s18, 2  ;;  %p200_p2 = scmp.lt.s32.totalorder %s773_s17, 3 }
   0x5   : > { %s863_s18 = smov (%p28_p1, %s26_s18), 0  ;;  %p201_p3 = pnand %p679_p0, %p200_p2 }
   0x6   : > { %v685_v0 = vld [vmem:[%s857_s2 + $0x8] sm:$0xff] (!%p201_p3)  ;;  %v267_v1 = vld [vmem:[%s857_s2] sm:$0xff] (!%p201_p3)  ;;  %p240_p4 = scmp.lt.s32.totalorder (!%p201_p3), %s765_s15, 1  ;;  %v775_v2 = vmov (!%p201_p3), 0.0   ;;  %vm776_vm0 = vmmov (!%p201_p3), 0   ;;  %vm271_vm1 = vcmask (!%p201_p3), 64512   ;;  %v419_v7 = vlaneseq (!%p201_p3) }
   0x7   : > { %204 = sbr.rel (%p201_p3) target bundleno = 240 (0xf0), region = 36  ;;  %705 = vmatprep.subr.mxu0 (!%p201_p3), %v775_v2  ;;  %710 = vmatprep.subr.mxu1 (!%p201_p3), %v775_v2  ;;  %v265_v10 = vld [vmem:[%s858_s3] sm:$0x1] (!%p201_p3)  ;;  %vm425_vm2 = vcmask (!%p201_p3), 260096   ;;  %vm578_vm3 = vcmask (!%p201_p3), 253952  }
   0x8   : > { %706 = vmatpush3.msra.mxu0 (!%p201_p3), %v685_v0  ;;  %711 = vmatpush3.msra.mxu1 (!%p201_p3), %v267_v1  ;;  %v420_v8 = vshrl.u32 (!%p201_p3), %v419_v7, 7 }
   0x9   : > { %707 = vmatprep.mubr.msk.f32.mxu0 (!%p201_p3), %vm776_vm0, %v775_v2  ;;  %712 = vmatprep.mubr.msk.f32.mxu1 (!%p201_p3), %vm776_vm0, %v775_v2 }
   0xa   : > { %715 = vmatprep.subr.mxu0 (!%p201_p3), %v775_v2  ;;  %720 = vmatprep.subr.mxu1 (!%p201_p3), %v775_v2  ;;  %v421_v9 = vsub.s32 (!%p201_p3), 0, %v420_v8 }
   0xc   : > { %v422_v11 = vrot.slane (!%p201_p3), %v265_v10, %v421_v9 }
   0xe   : > { %s865_s15 = smov (!%p240_p4, %s765_s15), 1 }
   0xf   : > { %s693_s23 = sshll.u32 %s865_s15, 4  ;;  %s684_s7 = sshll.u32 %s865_s15, 3 }
  0x10   : > { %s247_s26 = scalar_lea.vmem %s855_s0, %s693_s23  ;;  %s695_s27 = sadd.s32 8, %s693_s23 }
  0x11   : > { %v268_v3 = vld [vmem:[%s247_s26 + $0x1] sm:$0x7f]  ;;  %s256_s30 = scalar_lea.vmem %s856_s1, %s695_s27  ;;  %s264_s10 = scalar_lea.vmem %s859_s4, %s684_s7 }
  0x12   : > { %v266_v4 = vld [vmem:[%s247_s26] sm:$0x7f]  ;;  %708 = vmatmul.mubr.msk.f32.vlgmr.msra.gmra.mrb[0].mxu0 %vm271_vm1, %v268_v3  ;;  %v427_v6 = vld [vmem:[%s247_s26 + $0x7] sm:$0x1] }
  0x13   : > { %713 = vmatmul.mubr.msk.f32.vlgmr.msra.gmra.mrb[0].mxu1 %vm271_vm1, %v266_v4  ;;  %716 = vmatpush3.msra.mxu0 %v685_v0  ;;  %v429_v5 = vld [vmem:[%s256_s30] sm:$0x1] }
  0x14   : > { %721 = vmatpush3.msra.mxu1 %v267_v1  ;;  %717 = vmatprep.mubr.msk.f32.mxu0 %vm776_vm0, %v775_v2 }
  0x15   : > { %722 = vmatprep.mubr.msk.f32.mxu1 %vm776_vm0, %v775_v2 }
  0x16   : > { %718 = vmatmul.mubr.msk.f32.vlgmr.msra.gmra.mrb[2].mxu0 %vm271_vm1, %v429_v5 }
  0x17   : > { %723 = vmatmul.mubr.msk.f32.vlgmr.msra.gmra.mrb[2].mxu1 %vm271_vm1, %v427_v6 }
  0xe5   : > { %v341_v12 = vpop.f32.mrb[0].mxu0 }
  0xe6   : > { %v414_v13 = vpop.f32.mrb[0].mxu1  ;;  %v709_v15 = vpop.f32.mrb[1].mxu0 }
  0xe7   : > { %v415_v14 = vadd.f32 %v414_v13, %v341_v12  ;;  %v714_v16 = vpop.f32.mrb[1].mxu1 }
  0xe9   : > { %v424_v17 = vadd.f32 %v422_v11, %v415_v14  ;;  %v500_v18 = vpop.f32.mrb[2].mxu0 }
  0xea   : > { %v573_v19 = vpop.f32.mrb[2].mxu1  ;;  %v719_v21 = vpop.f32.mrb[3].mxu0 }
  0xeb   : > { %426 = vst.msk [vmem:[%s264_s10] sm:$0x7f] %vm425_vm2, %v424_v17  ;;  %v574_v20 = vadd.f32 %v573_v19, %v500_v18  ;;  %v724_v22 = vpop.f32.mrb[3].mxu1 }
  0xed   : > { %v577_v23 = vadd.f32 %v574_v20, %v265_v10 }
  0xef   : > { %579 = vst.msk [vmem:[%s264_s10 + $0x7] sm:$0x1] %vm578_vm3, %v577_v23 }
  0xf0 PF: > { %s14_s17 = sadd.s32 1, %s773_s17   ;;  %s860_s15 = smov %s769_s16 }
  0xf1   : > { %p11_p5 = scmp.ge.s32.totalorder %s14_s17, 4   ;;  %s861_s16 = smov %s863_s18 }
  0xf3   :  { %13 = sbr.rel (!%p11_p5) target bundleno = 2 (0x2), region = 70 }

</bundles_post_ra>
